<compile_context>
chip_gen: v7x
topology: tpu7x:2x2x1
jax: 0.10.0
libtpu: 0.0.40
codegen_flags: <defaults>
</compile_context>

<pallas_src>
import functools

import jax
import jax.numpy as jnp
from jax.experimental import pallas as pl
from jax.experimental.pallas import tpu as pltpu


def _ecm_kernel(cskip_ref,        # VMEM (1, Cp, 1)  f32   per-row c_skip
                x_ref,            # VMEM (1, Cp, T)  f32 (or bf16 if io_bf16)
                w1t_ref,          # VMEM (1, Dp, Cp) bf16  (c_in folded, block-diag)
                b1_ref,           # VMEM (1, Dp, 1)  f32   (shared)
                w2t_ref,          # VMEM (1, Cp, Dp) bf16  (c_out*(1+scale) folded)
                b2_ref,           # VMEM (1, Cp, 1)  f32   (c_out*((1+scale)*b2+shift))
                o_ref):           # VMEM (1, Cp, T)  f32 (or bf16)
    x = x_ref[0]
    x_bf = x.astype(jnp.bfloat16)
    # layer 1 (MXU, K = Cp), f32 accumulate; single cast then bf16 SiLU (EUP).
    h = jnp.dot(w1t_ref[0], x_bf, preferred_element_type=jnp.float32) + b1_ref[0]
    h_bf = h.astype(jnp.bfloat16)
    h_act = h_bf * jax.nn.sigmoid(h_bf)
    # layer 2 (MXU, K = Dp); c_out*(1+scale) & shift are pre-folded into W2'/b2'.
    f = jnp.dot(w2t_ref[0], h_act, preferred_element_type=jnp.float32) + b2_ref[0]
    o_ref[0] = (cskip_ref[0] * x.astype(jnp.float32) + f).astype(o_ref.dtype)


def _pick_tile(hw, *, bytes_per_t, n_batch_blocks,
               vmem_budget_bytes=20 << 20, want_steps=2):
    """Largest lane-aligned divisor of HW whose working set fits the VMEM budget,
    preferring a tiling that leaves >= `want_steps` total grid steps (megacore)."""
    if hw % 128 != 0:
        return hw                      # tiny / odd spatial sizes (perf only)
    cap = max(128, vmem_budget_bytes // bytes_per_t)
    divisors = [d for d in range(128, hw + 1, 128) if hw % d == 0]
    divisors.sort(reverse=True)
    for t in divisors:
        if t <= cap and n_batch_blocks * (hw // t) >= want_steps:
            return t
    for t in divisors:
        if t <= cap:
            return t
    return divisors[-1]


class ECMPrecondPallas:
    """EDM-style preconditioner; forward fused into a single Pallas TPU kernel."""

    def __init__(self, img_resolution, img_channels, label_dim=0, use_fp16=False,
                 sigma_min=0.003, sigma_max=float('inf'), sigma_data=0.5,
                 hidden_dim=32, emb_dim=16, io_bf16=False, seed=0):
        self.img_resolution = img_resolution
        self.img_channels = img_channels
        self.label_dim = label_dim
        self.use_fp16 = use_fp16
        self.sigma_min = sigma_min
        self.sigma_max = sigma_max
        self.sigma_data = float(sigma_data)
        self.hidden_dim = hidden_dim
        self.emb_dim = emb_dim
        self.io_bf16 = io_bf16

        C, Dh, De = img_channels, hidden_dim, emb_dim
        k = jax.random.PRNGKey(seed)
        ks = jax.random.split(k, 6)
        s = 0.1
        # sigma-only time-embedding branch (runs in the wrapper, f32).
        self.freq = s * jax.random.normal(ks[0], (1, De), jnp.float32)
        self.phase = s * jax.random.normal(ks[1], (1, De), jnp.float32)
        self.wemb = s * jax.random.normal(ks[2], (De, 2 * C), jnp.float32)
        self.bemb = jnp.zeros((1, 2 * C), jnp.float32)
        # pointwise channel MLP masters, f32 (per-batch folded bf16 copies are
        # built each call).
        self.w1t = s * jax.random.normal(ks[3], (Dh, C), jnp.float32)   # W1^T
        self.b1 = jnp.zeros((Dh, 1), jnp.float32)
        self.w2t = s * jax.random.normal(ks[4], (C, Dh), jnp.float32)   # W2^T
        self.b2 = jnp.zeros((C, 1), jnp.float32)

    # ---- wrapper-side precompute -------------------------------------------
    def _fold_params(self, sigma):
        """Fold c_in / c_out / FiLM into per-batch weight & bias copies."""
        C, sd = self.img_channels, self.sigma_data
        B = sigma.shape[0]
        denom = sigma * sigma + sd * sd
        inv_sqrt = jax.lax.rsqrt(denom)
        c_skip = (sd * sd) / denom                                 # (B,)
        c_out = sigma * sd * inv_sqrt                              # (B,)
        c_in = inv_sqrt                                            # (B,)
        c_noise = jnp.log(sigma) * 0.25                            # (B,)
        emb = jax.nn.silu(c_noise[:, None] * self.freq + self.phase)   # (B, De)
        gate = jnp.dot(emb, self.wemb) + self.bemb                 # (B, 2C)
        scale = gate[:, :C][:, :, None]                            # (B, C, 1)
        shift = gate[:, C:][:, :, None]                            # (B, C, 1)

        w1t_b = (c_in[:, None, None] * self.w1t[None]).astype(jnp.bfloat16)  # (B,Dh,C)
        g = c_out[:, None, None] * (1.0 + scale)                   # (B, C, 1)
        w2t_b = (g * self.w2t[None]).astype(jnp.bfloat16)          # (B, C, Dh)
        b2_b = g * self.b2[None] + c_out[:, None, None] * shift    # (B, C, 1)
        cskip_rows = jnp.broadcast_to(c_skip[:, None, None], (B, C, 1))
        return cskip_rows, w1t_b, w2t_b, b2_b

    @staticmethod
    def _block_diag(a, pack):
        """(B, R, S) -> (B//pack, pack*R, pack*S) block-diagonal per batch pair."""
        B, R, S = a.shape
        P = B // pack
        a = a.reshape(P, pack, R, S)
        out = jnp.zeros((P, pack * R, pack * S), a.dtype)
        for p in range(pack):
            out = out.at[:, p * R:(p + 1) * R, p * S:(p + 1) * S].set(a[:, p])
        return out

    # ---- forward -------------------------------------------------------------
    def __call__(self, x_nchw, sigma):
        sigma = sigma.astype(jnp.float32).reshape(-1)      # one sigma per batch item
        B, C, H, W = x_nchw.shape
        assert C == self.img_channels and H == W == self.img_resolution
        HW = H * W
        Dh = self.hidden_dim
        io_dtype = jnp.bfloat16 if self.io_bf16 else jnp.float32
        x = x_nchw.astype(io_dtype).reshape(B, C, HW)      # free reshape (channel-major)

        cskip, w1t_b, w2t_b, b2_b = self._fold_params(sigma)

        # pack two batch items per block so the (C, T) f32 tiles fill 8 sublanes.
        pack = 2 if (B % 2 == 0 and B >= 2) else 1
        P = B // pack
        Cp, Dp = pack * C, pack * Dh

        x_p = x.reshape(P, Cp, HW)                         # free reshape
        cskip_p = cskip.reshape(P, Cp, 1)
        b2_p = b2_b.reshape(P, Cp, 1)
        w1t_p = self._block_diag(w1t_b, pack)              # (P, Dp, Cp) bf16
        w2t_p = self._block_diag(w2t_b, pack)              # (P, Cp, Dp) bf16
        b1_p = jnp.tile(self.b1, (pack, 1))[None]          # (1, Dp, 1) f32, shared

        # VMEM-budget-driven tile size (bytes per lane element per grid step).
        io_bytes = 2 if self.io_bf16 else 4
        bytes_per_t = (4 * Cp * io_bytes                   # x + out, double-buffered
                       + Cp * (2 + 4 + 4)                  # x_bf16, f, blend temp
                       + Dp * (4 + 2))                     # h f32 + h bf16
        T = _pick_tile(HW, bytes_per_t=bytes_per_t, n_batch_blocks=P)
        grid = (P, HW // T)
        vmem_limit = int(min(40 << 20, max(16 << 20, 2 * bytes_per_t * T)))

        cost = pl.CostEstimate(
            flops=4 * C * Dh * B * HW,                     # two C<->Dh matmuls
            transcendentals=Dh * B * HW,                   # sigmoid on the hidden
            bytes_accessed=2 * B * C * HW * io_bytes)

        out = pl.pallas_call(
            _ecm_kernel,
            out_shape=jax.ShapeDtypeStruct((P, Cp, HW), io_dtype),
            grid=grid,
            in_specs=[
                pl.BlockSpec((1, Cp, 1), lambda p, t: (p, 0, 0)),      # c_skip rows
                pl.BlockSpec((1, Cp, T), lambda p, t: (p, 0, t)),      # x tile
                pl.BlockSpec((1, Dp, Cp), lambda p, t: (p, 0, 0)),     # folded W1^T
                pl.BlockSpec((1, Dp, 1), lambda p, t: (0, 0, 0)),      # b1 (shared)
                pl.BlockSpec((1, Cp, Dp), lambda p, t: (p, 0, 0)),     # folded W2^T
                pl.BlockSpec((1, Cp, 1), lambda p, t: (p, 0, 0)),      # folded bias
            ],
            out_specs=pl.BlockSpec((1, Cp, T), lambda p, t: (p, 0, t)),
            compiler_params=pltpu.CompilerParams(
                dimension_semantics=("parallel", "parallel"),
                vmem_limit_bytes=vmem_limit),
            cost_estimate=cost,
        )(cskip_p, x_p, w1t_p, b1_p, w2t_p, b2_p)

        return out.reshape(B, C, H, W)

    def round_sigma(self, sigma):
        return jnp.asarray(sigma)


# ---- references ----------------------------------------------------------------
def _reference_forward_f32(model, x_nchw, sigma):
    """Pure-f32 spec reference (unfolded ECMPrecond math), loose sanity bound."""
    x = x_nchw.astype(jnp.float32)
    B, C, H, W = x.shape
    sig = sigma.astype(jnp.float32).reshape(-1)
    s = sig.reshape(B, 1, 1)
    sd = model.sigma_data
    c_skip = sd ** 2 / (s ** 2 + sd ** 2)
    c_out = s * sd / jnp.sqrt(s ** 2 + sd ** 2)
    c_in = 1.0 / jnp.sqrt(sd ** 2 + s ** 2)
    c_noise = jnp.log(sig) / 4.0

    xc = x.reshape(B, C, H * W)
    emb = jax.nn.silu(c_noise[:, None] * model.freq + model.phase)
    gate = emb @ model.wemb + model.bemb
    scale = gate[:, :C][:, :, None]
    shift = gate[:, C:][:, :, None]

    xin = c_in * xc
    h = jax.nn.silu(jnp.einsum('dc,bct->bdt', model.w1t, xin) + model.b1)
    f = jnp.einsum('cd,bdt->bct', model.w2t, h) + model.b2
    f = f * (1.0 + scale) + shift
    d = c_skip * xc + c_out * f
    return d.reshape(B, C, H, W)


def _reference_forward_folded(model, x_nchw, sigma):
    """Same folded / bf16-operand math as the kernel, in plain JAX (tight check)."""
    B, C, H, W = x_nchw.shape
    HW = H * W
    sig = sigma.astype(jnp.float32).reshape(-1)
    cskip, w1t_b, w2t_b, b2_b = model._fold_params(sig)
    x = x_nchw.astype(jnp.float32).reshape(B, C, HW)
    x_bf = x.astype(jnp.bfloat16)
    h = jnp.einsum('bdc,bct->bdt', w1t_b, x_bf,
                   preferred_element_type=jnp.float32) + model.b1[None]
    h_bf = h.astype(jnp.bfloat16)
    h_act = h_bf * jax.nn.sigmoid(h_bf)
    f = jnp.einsum('bcd,bdt->bct', w2t_b, h_act,
                   preferred_element_type=jnp.float32) + b2_b
    d = cskip * x + f
    return d.reshape(B, C, H, W)


if __name__ == "__main__":
    B, C, R = 2, 4, 16
    model = ECMPrecondPallas(img_resolution=R, img_channels=C, seed=0)

    key = jax.random.PRNGKey(0)
    kx, ks = jax.random.split(key)
    x = jax.random.normal(kx, (B, C, R, R), jnp.float32)
    sigma = jnp.exp(jax.random.normal(ks, (B,), jnp.float32))  # strictly positive

    d_x = jax.block_until_ready(model(x, sigma))
    assert d_x.shape == (B, C, R, R)
    assert d_x.dtype == jnp.float32

    ref_tight = _reference_forward_folded(model, x, sigma)   # same math as kernel
    ref_spec = _reference_forward_f32(model, x, sigma)       # pure-f32 spec math
    assert jnp.max(jnp.abs(d_x - ref_tight)) < 2e-3
    assert jnp.max(jnp.abs(d_x - ref_spec)) < 3e-2

    print("KERNEL_OK")
</pallas_src>

<mosaic_0001>
module attributes {stable_mosaic.version = 11 : i64} {
  func.func @_ecm_kernel(%arg0: i32, %arg1: i32, %arg2: memref<1x8x1xf32, #tpu.memory_space<vmem>>, %arg3: memref<1x8x128xf32, #tpu.memory_space<vmem>>, %arg4: memref<1x64x8xbf16, #tpu.memory_space<vmem>>, %arg5: memref<1x64x1xf32, #tpu.memory_space<vmem>>, %arg6: memref<1x8x64xbf16, #tpu.memory_space<vmem>>, %arg7: memref<1x8x1xf32, #tpu.memory_space<vmem>>, %arg8: memref<1x8x128xf32, #tpu.memory_space<vmem>>) attributes {dimension_semantics = [#tpu.dimension_semantics<parallel>, #tpu.dimension_semantics<parallel>], iteration_bounds = array<i64: 1, 2>, scalar_prefetch = 0 : i64, scratch_operands = 0 : i64, tpu.core_type = #tpu.core_type<tc>, window_params = [{transform_indices = @transform_0, window_bounds = array<i64: 1, 8, 1>}, {transform_indices = @transform_1, window_bounds = array<i64: 1, 8, 128>}, {transform_indices = @transform_2, window_bounds = array<i64: 1, 64, 8>}, {pipeline_mode = #tpu.pipeline_mode<synchronous>, transform_indices = @transform_3, window_bounds = array<i64: 1, 64, 1>}, {transform_indices = @transform_4, window_bounds = array<i64: 1, 8, 64>}, {transform_indices = @transform_5, window_bounds = array<i64: 1, 8, 1>}, {transform_indices = @transform_6, window_bounds = array<i64: 1, 8, 128>}]} {
    %c0 = arith.constant 0 : index
    %c0_0 = arith.constant 0 : index
    %c0_1 = arith.constant 0 : index
    %0 = vector.load %arg3[%c0, %c0_0, %c0_1] : memref<1x8x128xf32, #tpu.memory_space<vmem>>, vector<1x8x128xf32>
    %1 = vector.shape_cast %0 : vector<1x8x128xf32> to vector<8x128xf32>
    %2 = arith.truncf %1 : vector<8x128xf32> to vector<8x128xbf16>
    %c0_2 = arith.constant 0 : index
    %c0_3 = arith.constant 0 : index
    %c0_4 = arith.constant 0 : index
    %3 = vector.load %arg4[%c0_2, %c0_3, %c0_4] : memref<1x64x8xbf16, #tpu.memory_space<vmem>>, vector<1x64x8xbf16>
    %4 = vector.shape_cast %3 : vector<1x64x8xbf16> to vector<64x8xbf16>
    %cst = arith.constant dense<0.000000e+00> : vector<64x128xf32>
    %5 = tpu.matmul %4, %2, %cst {dimension_numbers = #tpu.dot_dimension_numbers<[1], [0], [0], [1], [0, 0, 1, 1], [], []>} : vector<64x8xbf16>, vector<8x128xbf16>, vector<64x128xf32> -> vector<64x128xf32>
    %c0_5 = arith.constant 0 : index
    %c0_6 = arith.constant 0 : index
    %c0_7 = arith.constant 0 : index
    %6 = vector.load %arg5[%c0_5, %c0_6, %c0_7] : memref<1x64x1xf32, #tpu.memory_space<vmem>>, vector<1x64x1xf32>
    %7 = vector.shape_cast %6 : vector<1x64x1xf32> to vector<64x1xf32>
    %8 = vector.broadcast %7 : vector<64x1xf32> to vector<64x128xf32>
    %9 = arith.addf %5, %8 : vector<64x128xf32>
    %10 = arith.truncf %9 : vector<64x128xf32> to vector<64x128xbf16>
    %11 = arith.negf %10 : vector<64x128xbf16>
    %12 = math.exp %11 : vector<64x128xbf16>
    %cst_8 = arith.constant 1.000000e+00 : bf16
    %13 = vector.broadcast %cst_8 : bf16 to vector<64x128xbf16>
    %14 = arith.addf %13, %12 : vector<64x128xbf16>
    %15 = arith.divf %13, %14 : vector<64x128xbf16>
    %16 = arith.mulf %10, %15 : vector<64x128xbf16>
    %c0_9 = arith.constant 0 : index
    %c0_10 = arith.constant 0 : index
    %c0_11 = arith.constant 0 : index
    %17 = vector.load %arg6[%c0_9, %c0_10, %c0_11] : memref<1x8x64xbf16, #tpu.memory_space<vmem>>, vector<1x8x64xbf16>
    %18 = vector.shape_cast %17 : vector<1x8x64xbf16> to vector<8x64xbf16>
    %cst_12 = arith.constant dense<0.000000e+00> : vector<8x128xf32>
    %19 = tpu.matmul %18, %16, %cst_12 {dimension_numbers = #tpu.dot_dimension_numbers<[1], [0], [0], [1], [0, 0, 1, 1], [], []>} : vector<8x64xbf16>, vector<64x128xbf16>, vector<8x128xf32> -> vector<8x128xf32>
    %c0_13 = arith.constant 0 : index
    %c0_14 = arith.constant 0 : index
    %c0_15 = arith.constant 0 : index
    %20 = vector.load %arg7[%c0_13, %c0_14, %c0_15] : memref<1x8x1xf32, #tpu.memory_space<vmem>>, vector<1x8x1xf32>
    %21 = vector.shape_cast %20 : vector<1x8x1xf32> to vector<8x1xf32>
    %22 = vector.broadcast %21 : vector<8x1xf32> to vector<8x128xf32>
    %23 = arith.addf %19, %22 : vector<8x128xf32>
    %c0_16 = arith.constant 0 : index
    %c0_17 = arith.constant 0 : index
    %c0_18 = arith.constant 0 : index
    %24 = vector.load %arg2[%c0_16, %c0_17, %c0_18] : memref<1x8x1xf32, #tpu.memory_space<vmem>>, vector<1x8x1xf32>
    %25 = vector.shape_cast %24 : vector<1x8x1xf32> to vector<8x1xf32>
    %26 = vector.broadcast %25 : vector<8x1xf32> to vector<8x128xf32>
    %27 = arith.mulf %26, %1 : vector<8x128xf32>
    %28 = arith.addf %27, %23 : vector<8x128xf32>
    %c0_19 = arith.constant 0 : index
    %c0_20 = arith.constant 0 : index
    %c0_21 = arith.constant 0 : index
    %29 = vector.load %arg8[%c0_19, %c0_20, %c0_21] : memref<1x8x128xf32, #tpu.memory_space<vmem>>, vector<1x8x128xf32>
    %30 = vector.shape_cast %29 : vector<1x8x128xf32> to vector<8x128xf32>
    %31 = vector.shape_cast %28 : vector<8x128xf32> to vector<1x8x128xf32>
    tpu.vector_store %arg8[%c0_19, %c0_20, %c0_21], %31 {strides = array<i32>} : memref<1x8x128xf32, #tpu.memory_space<vmem>>, vector<1x8x128xf32>,
    return
  }
  func.func @transform_0(%arg0: i32, %arg1: i32) -> (i32, i32, i32) {
    %c0_i32 = arith.constant 0 : i32
    %c0_i32_0 = arith.constant 0 : i32
    %c0_i32_1 = arith.constant 0 : i32
    return %arg0, %c0_i32, %c0_i32_0 : i32, i32, i32
  }
  func.func @transform_1(%arg0: i32, %arg1: i32) -> (i32, i32, i32) {
    %c0_i32 = arith.constant 0 : i32
    %c0_i32_0 = arith.constant 0 : i32
    return %arg0, %c0_i32, %arg1 : i32, i32, i32
  }
  func.func @transform_2(%arg0: i32, %arg1: i32) -> (i32, i32, i32) {
    %c0_i32 = arith.constant 0 : i32
    %c0_i32_0 = arith.constant 0 : i32
    %c0_i32_1 = arith.constant 0 : i32
    return %arg0, %c0_i32, %c0_i32_0 : i32, i32, i32
  }
  func.func @transform_3(%arg0: i32, %arg1: i32) -> (i32, i32, i32) {
    %c0_i32 = arith.constant 0 : i32
    %c0_i32_0 = arith.constant 0 : i32
    %c0_i32_1 = arith.constant 0 : i32
    %c0_i32_2 = arith.constant 0 : i32
    return %c0_i32, %c0_i32_0, %c0_i32_1 : i32, i32, i32
  }
  func.func @transform_4(%arg0: i32, %arg1: i32) -> (i32, i32, i32) {
    %c0_i32 = arith.constant 0 : i32
    %c0_i32_0 = arith.constant 0 : i32
    %c0_i32_1 = arith.constant 0 : i32
    return %arg0, %c0_i32, %c0_i32_0 : i32, i32, i32
  }
  func.func @transform_5(%arg0: i32, %arg1: i32) -> (i32, i32, i32) {
    %c0_i32 = arith.constant 0 : i32
    %c0_i32_0 = arith.constant 0 : i32
    %c0_i32_1 = arith.constant 0 : i32
    return %arg0, %c0_i32, %c0_i32_0 : i32, i32, i32
  }
  func.func @transform_6(%arg0: i32, %arg1: i32) -> (i32, i32, i32) {
    %c0_i32 = arith.constant 0 : i32
    %c0_i32_0 = arith.constant 0 : i32
    return %arg0, %c0_i32, %arg1 : i32, i32, i32
  }
}

</mosaic_0001>

<bundles_post_ra>
// kernel: tpu_custom_call.1
= control target key start
LH: loop header
LB: loop body
LE: loop exit
PB: predicated region body
PF: predicated region fallthrough
CT: control target
= control target key end

     0   :  { %11 = vsyncpa [#allocation3], 0  ;;  %s1186_s0 = inlined_call_operand.vmem [shape: f32[1,8,1], index: 0, kind: input, shape index: {}]   ;;  %s1187_s1 = inlined_call_operand.vmem [shape: f32[1,8,256], index: 1, kind: input, shape index: {}]   ;;  %s1188_s2 = inlined_call_operand.vmem [shape: bf16[1,64,8], index: 2, kind: input, shape index: {}]   ;;  %s1189_s3 = inlined_call_operand.vmem [shape: f32[1,64,1], index: 3, kind: input, shape index: {}]   ;;  %s1190_s4 = inlined_call_operand.vmem [shape: bf16[1,8,64], index: 4, kind: input, shape index: {}]   ;;  %s1191_s5 = inlined_call_operand.vmem [shape: f32[1,8,1], index: 5, kind: input, shape index: {}]   ;;  %s1192_s6 = inlined_call_operand.hbm [shape: f32[1,8,256], index: 6, kind: output, shape index: {}]  }
   0x1   :  { %13 = vsyncpa [#allocation3 + $0x1], 0  ;;  %s1015_s21 = smov 0   ;;  %s1017_s22 = smov 0  }
   0x2   :  { %s1019_s23 = smov 0   ;;  %s1021_s24 = smov 0  }
   0x3   :  { %s1023_s25 = smov 0   ;;  %s1025_s26 = smov 0  }
   0x4 LB: > { %s755_s27 = sadd.s32 4294967295, %s974_s26   ;;  %s756_s28 = sadd.s32 4294967294, %s974_s26   ;;  %s974_s26 = sphi %s1025_s26, %s19_s26   ;;  %s970_s25 = sphi %s1023_s25, %s1199_s25   ;;  %s966_s24 = sphi %s1021_s24, %s1198_s24   ;;  %s962_s23 = sphi %s1019_s23, %s1197_s23   ;;  %s958_s22 = sphi %s1017_s22, %s1196_s22   ;;  %s954_s21 = sphi %s1015_s21, %s1195_s21  }
   0x5   : > { %s28_s29 = sadd.s32 1, %s970_s25  ;;  %s193_s30 = sadd.s32 1, %s962_s23 }
   0x6   : > { %p29_p0 = scmp.ge.s32.totalorder %s28_s29, 2  ;;  %p203_p1 = scmp.ne.s32.totalorder %s962_s23, %s958_s22 }
   0x7   : > { %p204_p2 = scmp.eq.s32.totalorder %s755_s27, 1  ;;  %p209_p3 = scmp.ne.s32.totalorder %s958_s22, %s954_s21 }
   0x8   : > { %s1201_s29 = smov (%p29_p0, %s28_s29), 0  ;;  %p210_p5 = scmp.eq.s32.totalorder %s756_s28, 1 }
   0x9   : > { %p1055_p4 = por %p204_p2, %p203_p1  ;;  %s189_s8 = ssub.s32 %s970_s25, %s1201_s29 }
   0xa   : > { %p763_p6 = scmp.ge.s32.totalorder %s974_s26, 1  ;;  %p191_p7 = scmp.eq.s32.totalorder %s189_s8, 0 }
   0xb   : > { %p1062_p8 = por %p210_p5, %p209_p3  ;;  %p271_p9 = scmp.lt.s32.totalorder %s974_s26, 3 }
   0xc   : > { %s1068_s10 = scalar_select %p191_p7, %s962_s23, %s193_s30  }
   0xd   : > { %p272_p10 = pnand %p763_p6, %p271_p9 }
   0xe   : > { %p327_p11 = scmp.lt.s32.totalorder (!%p272_p10), %s966_s24, 1  ;;  %v876_v0 = vld [vmem:[%s1188_s2] sm:$0xff] (!%p272_p10)   ;;  %vm426_vm0 = vcmask (!%p272_p10), 64512   ;;  %v976_v1 = vmov (!%p272_p10), 0   ;;  %v360_v3 = vld [vmem:[%s1189_s3 + $0x10] sm:$0xff] (!%p272_p10)  ;;  %vm439_vm1 = vcmask (!%p272_p10), 1043456  }
   0xf   : > { %275 = sbr.rel (%p272_p10) target bundleno = 529 (0x211), region = 44  ;;  %795 = vmatprep.mubr.msk.bf16.mxu0 (!%p272_p10), %vm426_vm0, %v876_v0  ;;  %874 = vset.pattern.permute.xlu0 (!%p272_p10), %v976_v1  ;;  %v358_v2 = vld [vmem:[%s1189_s3] sm:$0xff] (!%p272_p10)  ;;  %v359_v5 = vld [vmem:[%s1189_s3 + $0x8] sm:$0xff] (!%p272_p10)  ;;  %v361_v7 = vld [vmem:[%s1189_s3 + $0x18] sm:$0xff] (!%p272_p10)  ;;  %v977_v18 = vmov (!%p272_p10), 0.0   ;;  %vm978_vm2 = vmmov (!%p272_p10), 0  }
  0x10   : > { %875 = vset.pattern.permute.xlu1 (!%p272_p10), %v976_v1  ;;  %368 = vperm.xlu0 (!%p272_p10), %874, %v358_v2   ;;  %v877_v9 = vld [vmem:[%s1188_s2 + $0x8] sm:$0xff] (!%p272_p10)   ;;  %v878_v10 = vld [vmem:[%s1188_s2 + $0x10] sm:$0xff] (!%p272_p10)   ;;  %v362_v11 = vld [vmem:[%s1189_s3 + $0x20] sm:$0xff] (!%p272_p10)  ;;  %vm551_vm3 = vcmask (!%p272_p10), 523264   ;;  %s318_s18 = sand.u32 (!%p272_p10), 1, %s958_s22   ;;  %s780_s20 = sshll.u32 (!%p272_p10), %s966_s24, 7 }
  0x11   : > { %378 = vperm.xlu1 (!%p272_p10), %875, %v360_v3   ;;  %v363_v12 = vld [vmem:[%s1189_s3 + $0x28] sm:$0xff] (!%p272_p10)  ;;  %v364_v13 = vld [vmem:[%s1189_s3 + $0x30] sm:$0xff] (!%p272_p10)  ;;  %v365_v14 = vld [vmem:[%s1189_s3 + $0x38] sm:$0xff] (!%p272_p10)  ;;  %803 = vmatprep.subr.bf16.mxu1 (!%p272_p10), %v977_v18  ;;  %s764_s19 = sshll.u32 (!%p272_p10), %s318_s18, 3  ;;  %s1139_s11 = scalar_lea.hbm (!%p272_p10), %s1192_s6, %s780_s20 }
  0x12   : > { %v879_v15 = vld [vmem:[%s1188_s2 + $0x18] sm:$0xff] (!%p272_p10)   ;;  %v545_v16 = vld [vmem:[%s1191_s5] sm:$0xff] (!%p272_p10)  ;;  %811 = vmatprep.mubr.msk.bf16.mxu1 (!%p272_p10), %vm978_vm2, %v977_v18 }
  0x13   : > { %v595_v17 = vld [vmem:[%s1186_s0] sm:$0xff] (!%p272_p10) }
  0x14   : > { %373 = vperm.xlu0 (!%p272_p10), %874, %v359_v5  }
  0x15   : > { %383 = vperm.xlu1 (!%p272_p10), %875, %v361_v7  }
  0x16   : > { %s328_s13 = scalar_select %p327_p11, %s966_s24, 1 }
  0x17   : > { %s605_s24 = scalar_lea.sflag [#allocation3], %s318_s18 }
  0x18   : > { %s765_s14 = sshll.u32 %s328_s13, 3  ;;  %388 = vperm.xlu0 %874, %v362_v11   ;;  %s979_s13 = smov [#allocation2]  }
  0x19   : > { %s332_s27 = scalar_lea.vmem %s1187_s1, %s765_s14  ;;  %393 = vperm.xlu1 %875, %v363_v12   ;;  %s900_s14 = sshll.u32 %s979_s13, 4  ;;  %s901_s14 = int_to_ptr.vmem [resolvable:$false] %s900_s14 }
  0x1a   : > { %v1085_v4 = vld [vmem:[%s332_s27] sm:$0xff]  ;;  %s320_s27 = scalar_lea.vmem [#allocation2], %s764_s19  ;;  %s902_s15 = scalar_lea.vmem %s901_s14, 256 }
  0x1b   : > { %v349_v6 = vpack.c.bf16 %v1085_v4, %v1085_v4  ;;  %s620_s28 = sshll.u32 %s320_s27, 4  ;;  %s1141_s28 = int_to_ptr.vmem [resolvable:$true] %s620_s28 }
  0x1c   : > { %398 = vperm.xlu0 %874, %v364_v13   ;;  %s896_s12 = scalar_lea.vmem %s1141_s28, 128  ;;  %p903_p1 = scmp.lt.s32.totalorder %s1141_s28, %s901_s14 }
  0x1d   : > { %815 = vmatprep.subr.msk.bf16.mxu0 %vm439_vm1, %v349_v6  ;;  %v441_v8 = vsel %vm439_vm1, %v349_v6, 0  ;;  %403 = vperm.xlu1 %875, %v365_v14   ;;  %p897_p12 = scmp.ne.s32.totalorder %s1141_s28, %s896_s12  ;;  %p904_p2 = scmp.lt.s32.totalorder %s902_s15, %s896_s12 }
  0x1e   : > { %794 = vmatpush3.bf16.msra.mxu0 %v441_v8  ;;  %v544_v8 = vld [vmem:[%s1190_s4] sm:$0xf] }
  0x1f   : > { %p898_p13 = pnand %p897_p12, %p1055_p4  ;;  %p905_p3 = por %p904_p2, %p903_p1 }
  0x20   : > { %548 = vperm.xlu0 %874, %v545_v16  }
  0x21   : > { %796 = vmatmul.mubr.msk.bf16.vlgmr.msra.gmra.mrb[0].mxu0 %vm426_vm0, %v877_v9  ;;  %598 = vperm.xlu1 %875, %v595_v17   ;;  %p899_p0 = pneg %p898_p13 }
  0x22   : > { %799 = vmatprep.mubr.msk.bf16.mxu0 %vm426_vm0, %v878_v10 }
  0x23   : > { %p906_p5 = pnand %p905_p3, %p899_p0 }
  0x29   : > { %800 = vmatmul.mubr.msk.bf16.gmra.mrb[4].mxu0 %vm426_vm0, %v879_v15 }
  0x8f   : > { %v369_v19 = vpop.permute.xlu0 %368 }
  0x90   : > { %v379_v20 = vpop.permute.xlu1 %378 }
  0x93   : > { %v374_v21 = vpop.permute.xlu0 %373 }
  0x94   : > { %v384_v22 = vpop.permute.xlu1 %383 }
  0x97   : > { %v389_v26 = vpop.permute.xlu0 %388 }
  0x98   : > { %v394_v30 = vpop.permute.xlu1 %393 }
  0x9b   : > { %v399_v38 = vpop.permute.xlu0 %398 }
  0x9c   : > { %v404_v40 = vpop.permute.xlu1 %403 }
  0x9f   : > { %v549_v10 = vpop.permute.xlu0 %548 }
  0xa0   : > { %v599_v9 = vpop.permute.xlu1 %598 }
  0xa1   : > { %v601_v12 = vmul.f32 %v599_v9, %v1085_v4 }
  0xf4   : > { %v797_v23 = vpop.f32.mrb[0].mxu0 }
  0xf5   : > { %v477_v24 = vpop.f32.mrb[1].mxu0  ;;  %v486_v27 = vadd.f32 %v797_v23, %v379_v20 }
  0xf6   : > { %v798_v25 = vpop.f32.mrb[2].mxu0  ;;  %v478_v31 = vadd.f32 %v477_v24, %v369_v19 }
  0xf7   : > { %v489_v28 = vadd.f32 %v798_v25, %v384_v22  ;;  %v480_v29 = vpop.f32.mrb[3].mxu0 }
  0xf8   : > { %v481_v32 = vadd.f32 %v480_v29, %v374_v21 }
  0xf9   : > { %v509_v33 = vpack.c.bf16 %v489_v28, %v486_v27 }
  0xfa   : > { %v508_v34 = vpack.c.bf16 %v481_v32, %v478_v31 }
  0xfb   : > { %v775_v35 = vmul.bf16 3216621497, %v509_v33 }
  0xfc   : > { %v774_v36 = vmul.bf16 3216621497, %v508_v34  ;;  %v801_v37 = vpop.f32.mrb[4].mxu0 }
  0xfd   : > { %880 = vpow.bf16 %v775_v35  ;;  %v493_v39 = vpop.f32.mrb[5].mxu0  ;;  %v502_v42 = vadd.f32 %v801_v37, %v399_v38 }
  0xfe   : > { %882 = vpow.bf16 %v774_v36  ;;  %v802_v41 = vpop.f32.mrb[6].mxu0  ;;  %v494_v45 = vadd.f32 %v493_v39, %v389_v26 }
  0xff   : > { %v505_v43 = vadd.f32 %v802_v41, %v404_v40  ;;  %v496_v44 = vpop.f32.mrb[7].mxu0 }
 0x100   : > { %v497_v46 = vadd.f32 %v496_v44, %v394_v30 }
 0x101   : > { %v511_v47 = vpack.c.bf16 %v505_v43, %v502_v42 }
 0x102   : > { %v510_v48 = vpack.c.bf16 %v497_v46, %v494_v45 }
 0x103   : > { %v777_v49 = vmul.bf16 3216621497, %v511_v47 }
 0x104   : > { %v776_v50 = vmul.bf16 3216621497, %v510_v48 }
 0x105   : > { %884 = vpow.bf16 %v777_v49 }
 0x106   : > { %886 = vpow.bf16 %v776_v50 }
 0x108   : > { %v881_v51 = vpop.eup %880 }
 0x109   : > { %v883_v52 = vpop.eup %882  ;;  %v529_v53 = vadd.bf16 1065369472, %v881_v51 }
 0x10a   : > { %v528_v54 = vadd.bf16 1065369472, %v883_v52 }
 0x10b   : > { %888 = vrcp.bf16 %v529_v53 }
 0x10c   : > { %890 = vrcp.bf16 %v528_v54 }
 0x110   : > { %v885_v55 = vpop.eup %884 }
 0x111   : > { %v887_v56 = vpop.eup %886  ;;  %v531_v57 = vadd.bf16 1065369472, %v885_v55 }
 0x112   : > { %v530_v58 = vadd.bf16 1065369472, %v887_v56 }
 0x113   : > { %892 = vrcp.bf16 %v531_v57 }
 0x114   : > { %894 = vrcp.bf16 %v530_v58 }
 0x116   : > { %v889_v59 = vpop.eup %888 }
 0x117   : > { %v891_v60 = vpop.eup %890  ;;  %v535_v63 = vmul.bf16 1065369472, %v889_v59 }
 0x118   : > { %v533_v61 = vmul.bf16 1065369472, %v891_v60 }
 0x119   : > { %v541_v1 = vmul.bf16 %v535_v63, %v509_v33 }
 0x11a   : > { %v540_v62 = vmul.bf16 %v533_v61, %v508_v34 }
 0x11c   : > { %804 = vmatpush3.bf16.msra.mxu1 %v540_v62 }
 0x11d   : > { %805 = vmatprep.subr.bf16.mxu1 %v977_v18 }
 0x11e   : > { %v893_v0 = vpop.eup %892 }
 0x11f   : > { %v895_v2 = vpop.eup %894  ;;  %v539_v6 = vmul.bf16 1065369472, %v893_v0 }
 0x120   : > { %806 = vmatpush3.bf16.msra.mxu1 %v541_v1  ;;  %v537_v3 = vmul.bf16 1065369472, %v895_v2 }
 0x121   : > { %807 = vmatprep.subr.bf16.mxu1 %v977_v18  ;;  %v543_v7 = vmul.bf16 %v539_v6, %v511_v47 }
 0x122   : > { %v542_v5 = vmul.bf16 %v537_v3, %v510_v48 }
 0x124   : > { %808 = vmatpush3.bf16.msra.mxu1 %v542_v5 }
 0x125   : > { %809 = vmatprep.subr.bf16.mxu1 %v977_v18 }
 0x128   : > { %810 = vmatpush3.bf16.msra.mxu1 %v543_v7 }
 0x12b   : > { %812 = vmatmul.mubr.msk.bf16.vlgmr.msra.gmra.mrb[0].mxu1 %vm551_vm3, %v544_v8 }
 0x1fe   : > { %v589_v11 = vpop.f32.mrb[0].mxu1 }
 0x1ff   : > { %v590_v13 = vadd.f32 %v589_v11, %v549_v10  ;;  %v813_v14 = vpop.f32.mrb[1].mxu1 }
 0x200   : > { %v592_v15 = vpop.f32.mrb[2].mxu1 }
 0x201   : > { %v602_v16 = vadd.f32 %v601_v12, %v590_v13  ;;  %v814_v17 = vpop.f32.mrb[3].mxu1 }
 0x203   : > { %603 = vst [vmem:[%s320_s27] sm:$0xff] %v602_v16 }
 0x204   : > { %909 = shalt.err (!%p906_p5)
}
 0x205   : > { %s910_s16 = scalar_lea.hbm %s1139_s11, 128  ;;  %s914_s19 = scalar_lea.hbm %s1192_s6, 256 }
 0x206   : > { %p911_p6 = scmp.ne.s32.totalorder %s1139_s11, %s910_s16  ;;  %p915_p10 = scmp.lt.u32.totalorder %s1139_s11, %s1192_s6 }
 0x207   : > { %p916_p11 = scmp.lt.u32.totalorder %s914_s19, %s910_s16  ;;  %p918_p13 = scmp.lt.u32.totalorder %s910_s16, %s1139_s11 }
 0x208   : > { %p912_p7 = pnand %p911_p6, %p1055_p4 }
 0x209   : > { %p917_p12 = por %p916_p11, %p915_p10 }
 0x20a   : > { %p913_p9 = pneg %p912_p7 }
 0x20b   : > { %p919_p0 = por %p918_p13, %p917_p12 }
 0x20d   : > { %p920_p1 = pnand %p919_p0, %p913_p9 }
 0x20f   : > { %923 = shalt.err (!%p920_p1)
}
 0x210   : > { %816 = dma.vmem_to_hbm [thread:$0]  (%p1055_p4), %s1141_s28, 128, %s1139_s11, %s605_s24  }
 0x211 PF: > { %p822_p2 = scmp.ge.s32.totalorder %s974_s26, 2  ;;  %s632_s30 = sand.u32 1, %s954_s21  }
 0x212   : > { %s633_s8 = scalar_lea.sflag [#allocation3], %s632_s30 }
 0x213   : > { %p819_p3 = pnand %p822_p2, %p1062_p8 }
 0x215   : > { %949 = dma.done.wait (!%p819_p3), %s633_s8, 128  }
 0x216   : > { %951 = vsyncadd (!%p819_p3), %s633_s8, 4294967168  ;;  %s19_s26 = sadd.s32 1, %s974_s26   ;;  %s1195_s21 = smov %s958_s22 }
 0x217   : > { %p16_p5 = scmp.ge.s32.totalorder %s19_s26, 4   ;;  %s1196_s22 = smov %s962_s23 }
 0x218   : > { %s1197_s23 = smov %s1068_s10  ;;  %s1198_s24 = smov %s970_s25 }
 0x219   : > { %s1199_s25 = smov %s1201_s29  ;;  %18 = sbr.rel (!%p16_p5) target bundleno = 4 (0x4), region = 91 }
 0x220   :  { %638 = vsyncpa [#allocation3], 1 }
 0x221   :  { %640 = vsyncpa [#allocation3 + $0x1], 1 }

</bundles_post_ra>
